<compile_context>
chip_gen: v7x
topology: tpu7x:2x2x1
jax: 0.10.0
libtpu: 0.0.40
codegen_flags: <defaults>
</compile_context>

<pallas_src>
import functools

import jax
import jax.numpy as jnp
from jax import lax
from jax.experimental import pallas as pl
from jax.experimental.pallas import tpu as pltpu


_ROWS_CAP = 768           # caps the (rows x rows) kron weight at 2.25 MiB f32


def _cdiv(a, b):
    return -(-a // b)


def _round_up(v, m):
    return _cdiv(v, m) * m


def _tpu_vmem_bytes():
    """Best-effort per-core VMEM capacity; conservative (v7x, 64 MiB) fallback."""
    try:
        return int(pltpu.get_tpu_info().vmem_capacity_bytes)
    except Exception:
        return 64 << 20


def _vmem_need(bt, c, hw, itemsize):
    """VMEM for one grid step: double-buffered in/out blocks + kron weight + slack."""
    rows = bt * c
    block = rows * hw * itemsize
    wk = rows * rows * 4
    return 4 * block + 2 * wk + (2 << 20)


def _pick_config(b, c, hw, itemsize):
    """Choose the batch tile bt (examples per grid step) and a vmem limit."""
    vmem_cap = _tpu_vmem_bytes()
    two_core_chip = vmem_cap < (100 << 20)    # v7x proxy: 64 MiB VMEM, 2 TCs/chip
    block_target = (4 << 20) if two_core_chip else (8 << 20)
    budget = max(16 << 20, vmem_cap - (16 << 20))
    mult = 4 if itemsize >= 4 else 8          # rows % 8 (f32) / rows % 16 (packed)
    bt_cap = max(1, _ROWS_CAP // c)

    def legal(v):
        v = min(v, b, bt_cap)
        if v >= b or b <= mult:
            return b                          # block rows == full extent (exempt)
        return max(mult, (v // mult) * mult)

    bt = legal(max(1, block_target // max(1, c * hw * itemsize)))

    # Never leave a 1-step grid when the batch is comfortably splittable:
    # with dimension_semantics=("parallel",) a single step idles one whole
    # TensorCore on v7x; the extra ~0.35us step is noise on 1-TC chips.
    if bt == b and b >= 2 * mult:
        split = legal(_round_up(_cdiv(b, 2), mult))
        if split < b:
            bt = split

    # On 2-TC chips prefer an even step count so no core idles on the tail.
    steps = _cdiv(b, bt)
    if two_core_chip and steps > 2 and steps % 2 == 1:
        bt_even = _round_up(_cdiv(b, steps + 1), mult)
        if mult <= bt_even < bt and _cdiv(b, bt_even) % 2 == 0:
            bt = bt_even

    # VMEM guard: shrink the batch tile until one pipeline step fits the budget.
    while _vmem_need(bt, c, hw, itemsize) > budget:
        floor_bt = b if b <= mult else mult
        if bt <= floor_bt:
            # TODO(synk): add a two-pass spatially-tiled path (accumulate row
            # sums over h*w chunks, then re-stream to scale) for huge h*w.
            raise ValueError(
                "ChannelWeightLayer1 Pallas kernel: spatial size h*w="
                f"{hw} (itemsize {itemsize}) needs a "
                f"{_vmem_need(floor_bt, c, hw, itemsize) >> 20} MiB pipeline "
                f"step, exceeding the {budget >> 20} MiB VMEM budget.")
        bt = legal(bt // 2)

    need = _vmem_need(bt, c, hw, itemsize)
    vmem_limit = int(max(16 << 20, min(vmem_cap - (4 << 20), need + (8 << 20))))
    return bt, vmem_limit


def _channel_weight_kernel(x_ref, wk_ref, o_ref, *, total_rows, need_mask):
    # x_ref : (rows, hw)   rows = (batch-tile, channel) folded; lanes = spatial
    # wk_ref: (rows, rows) block-diagonal (I_bt (x) W) / (h*w), pre-cast to f32
    # Per-row spatial sum, accumulated in f32 (1/(h*w) is folded into wk).
    row_sum = jnp.sum(x_ref[...], axis=-1, keepdims=True, dtype=jnp.float32)
    if need_mask:
        # Partial last block: rows past b*c hold stale VMEM data; zero their
        # sums so a stray Inf/NaN cannot leak through 0*Inf in the matvec.
        rows = x_ref.shape[0]
        row_ids = pl.program_id(0) * rows + lax.broadcasted_iota(
            jnp.int32, (rows, 1), 0)
        row_sum = jnp.where(row_ids < total_rows, row_sum, 0.0)
    # Linear(6,6,bias=False) for the whole batch tile: (I (x) W/hw) @ row_sum.
    z = jnp.dot(wk_ref[...], row_sum, preferred_element_type=jnp.float32)
    y = jax.nn.sigmoid(jnp.maximum(z, 0.0))          # ReLU -> Sigmoid, f32
    # Per-row scale broadcast over the spatial (lane) axis, in input dtype.
    o_ref[...] = x_ref[...] * y.astype(o_ref.dtype)


def channel_weight_layer1(x, w):
    """x: (b, c, h, w); w: (c, c) Linear weight (out_features, in_features)."""
    b, c, h, wdim = x.shape
    hw = h * wdim
    itemsize = jnp.dtype(x.dtype).itemsize
    bt, vmem_limit = _pick_config(b, c, hw, itemsize)
    rows = bt * c
    total_rows = b * c
    steps = _cdiv(total_rows, rows)

    # Metadata-only reshape: no HBM pad copies, no output slice copy.
    x2 = x.reshape(total_rows, hw)

    # Block-diagonal (I_bt (x) W), pre-cast to f32 and pre-scaled by 1/(h*w)
    # so the kernel dots the raw f32 row sums directly.  Kept deliberately
    # small (rows <= 768 => <= 2.25 MiB) so VMEM goes to the streamed block.
    w_kron = jnp.kron(jnp.eye(bt, dtype=jnp.float32),
                      w.astype(jnp.float32) * jnp.float32(1.0 / hw))

    kernel = functools.partial(
        _channel_weight_kernel,
        total_rows=total_rows,
        need_mask=(total_rows % rows != 0),
    )

    out = pl.pallas_call(
        kernel,
        out_shape=jax.ShapeDtypeStruct((total_rows, hw), x.dtype),
        grid_spec=pltpu.PrefetchScalarGridSpec(
            num_scalar_prefetch=0,
            grid=(steps,),
            in_specs=[
                # last dim == full spatial extent (exempt from the 128 rule);
                # row dim is a multiple of 8 or the full extent -> legal.
                pl.BlockSpec((rows, hw), lambda i: (i, 0)),
                # constant weight, revisited every step (small by construction).
                pl.BlockSpec((rows, rows), lambda i: (0, 0)),
            ],
            out_specs=pl.BlockSpec((rows, hw), lambda i: (i, 0)),
        ),
        compiler_params=pltpu.CompilerParams(
            dimension_semantics=("parallel",),
            vmem_limit_bytes=vmem_limit,
        ),
    )(x2, w_kron)

    return out.reshape(b, c, h, wdim)


def _reference(x, w):
    # pure-JAX reference of the PyTorch forward
    y = jnp.mean(x, axis=(2, 3))                       # (b, c)
    y = jax.nn.sigmoid(jnp.maximum(y @ w.T, 0.0))      # (b, c)
    return x * y[:, :, None, None]


if __name__ == "__main__":
    key = jax.random.PRNGKey(0)
    kx, kw = jax.random.split(key)

    # module implies 6 input channels (Linear(6, 6))
    b, c, h, wdim = 2, 6, 16, 16
    x = jax.random.normal(kx, (b, c, h, wdim), dtype=jnp.float32)

    # deterministic synthetic Linear(6, 6, bias=False) weight
    bound = 1.0 / jnp.sqrt(float(c))
    w = jax.random.uniform(kw, (c, c), dtype=jnp.float32, minval=-bound, maxval=bound)

    out = channel_weight_layer1(x, w)
    out = jax.block_until_ready(out)

    ref = _reference(x, w)
    assert out.shape == (b, c, h, wdim)
    assert jnp.allclose(out, ref, atol=1e-5, rtol=1e-5)

    print("KERNEL_OK")
</pallas_src>

<mosaic_0001>
module attributes {stable_mosaic.version = 11 : i64} {
  func.func @_channel_weight_kernel(%arg0: i32, %arg1: memref<12x256xf32, #tpu.memory_space<vmem>>, %arg2: memref<12x12xf32, #tpu.memory_space<vmem>>, %arg3: memref<12x256xf32, #tpu.memory_space<vmem>>) attributes {dimension_semantics = [#tpu.dimension_semantics<parallel>], iteration_bounds = array<i64: 1>, scalar_prefetch = 0 : i64, scratch_operands = 0 : i64, tpu.core_type = #tpu.core_type<tc>, window_params = [{transform_indices = @transform_0, window_bounds = array<i64: 12, 256>}, {pipeline_mode = #tpu.pipeline_mode<synchronous>, transform_indices = @transform_1, window_bounds = array<i64: 12, 12>}, {transform_indices = @transform_2, window_bounds = array<i64: 12, 256>}]} {
    %c0 = arith.constant 0 : index
    %c0_0 = arith.constant 0 : index
    %0 = vector.load %arg1[%c0, %c0_0] : memref<12x256xf32, #tpu.memory_space<vmem>>, vector<12x256xf32>
    %cst = arith.constant dense<0.000000e+00> : vector<12xf32>
    %1 = vector.multi_reduction <add>, %0, %cst [1] : vector<12x256xf32> to vector<12xf32>
    %2 = vector.shape_cast %1 : vector<12xf32> to vector<12x1xf32>
    %c0_1 = arith.constant 0 : index
    %c0_2 = arith.constant 0 : index
    %3 = vector.load %arg2[%c0_1, %c0_2] : memref<12x12xf32, #tpu.memory_space<vmem>>, vector<12x12xf32>
    %cst_3 = arith.constant dense<0.000000e+00> : vector<12x1xf32>
    %4 = tpu.matmul %3, %2, %cst_3 {dimension_numbers = #tpu.dot_dimension_numbers<[1], [0], [0], [1], [0, 0, 1, 1], [], []>} : vector<12x12xf32>, vector<12x1xf32>, vector<12x1xf32> -> vector<12x1xf32>
    %cst_4 = arith.constant 0.000000e+00 : f32
    %5 = vector.broadcast %cst_4 : f32 to vector<12x1xf32>
    %6 = arith.maximumf %4, %5 : vector<12x1xf32>
    %7 = arith.negf %6 : vector<12x1xf32>
    %8 = math.exp %7 : vector<12x1xf32>
    %cst_5 = arith.constant 1.000000e+00 : f32
    %9 = vector.broadcast %cst_5 : f32 to vector<12x1xf32>
    %10 = arith.addf %9, %8 : vector<12x1xf32>
    %11 = arith.divf %9, %10 : vector<12x1xf32>
    %c0_6 = arith.constant 0 : index
    %c0_7 = arith.constant 0 : index
    %12 = vector.load %arg1[%c0_6, %c0_7] : memref<12x256xf32, #tpu.memory_space<vmem>>, vector<12x256xf32>
    %13 = vector.broadcast %11 : vector<12x1xf32> to vector<12x256xf32>
    %14 = arith.mulf %12, %13 : vector<12x256xf32>
    %c0_8 = arith.constant 0 : index
    %c0_9 = arith.constant 0 : index
    %15 = vector.load %arg3[%c0_8, %c0_9] : memref<12x256xf32, #tpu.memory_space<vmem>>, vector<12x256xf32>
    tpu.vector_store %arg3[%c0_8, %c0_9], %14 {strides = array<i32>} : memref<12x256xf32, #tpu.memory_space<vmem>>, vector<12x256xf32>,
    return
  }
  func.func @transform_0(%arg0: i32) -> (i32, i32) {
    %c0_i32 = arith.constant 0 : i32
    %c0_i32_0 = arith.constant 0 : i32
    return %arg0, %c0_i32 : i32, i32
  }
  func.func @transform_1(%arg0: i32) -> (i32, i32) {
    %c0_i32 = arith.constant 0 : i32
    %c0_i32_0 = arith.constant 0 : i32
    %c0_i32_1 = arith.constant 0 : i32
    return %c0_i32, %c0_i32_0 : i32, i32
  }
  func.func @transform_2(%arg0: i32) -> (i32, i32) {
    %c0_i32 = arith.constant 0 : i32
    %c0_i32_0 = arith.constant 0 : i32
    return %arg0, %c0_i32 : i32, i32
  }
}

</mosaic_0001>

<bundles_post_ra>
// kernel: tpu_custom_call.1
= control target key start
LH: loop header
LB: loop body
LE: loop exit
PB: predicated region body
PF: predicated region fallthrough
CT: control target
= control target key end

     0   :  { %7 = vsyncpa [#allocation3], 0  ;;  %s372_s0 = inlined_call_operand.hbm [shape: f32[12,256], index: 0, kind: input, shape index: {}]   ;;  %s373_s1 = inlined_call_operand.hbm [shape: f32[12,12], index: 1, kind: input, shape index: {}]   ;;  %s374_s2 = inlined_call_operand.hbm [shape: f32[12,256], index: 2, kind: output, shape index: {}]  }
   0x1   :  { %8 = vsyncpa [#allocation6], 0 }
   0x2   :  { %9 = vsyncpa [#allocation4], 0  ;;  %s303_s9 = smov [#allocation2]   ;;  %s231_s13 = scalar_lea.hbm %s372_s0, 512 }
   0x3   :  { %s15_s10 = sshll.u32 %s303_s9, 4  ;;  %p232_p0 = scmp.ne.s32.totalorder %s372_s0, %s231_s13  ;;  %s16_s10 = int_to_ptr.vmem [resolvable:$true] %s15_s10 }
   0x4   :  { %p235_p1 = scmp.lt.u32.totalorder %s231_s13, %s372_s0 }
   0x6   :  { %p237_p2 = pnand %p235_p1, %p232_p0 }
   0x8   :  { %240 = shalt.err (!%p237_p2)
}
   0x9   :  { %s241_s18 = scalar_lea.vmem %s16_s10, 512  ;;  %p246_p4 = scmp.lt.s32.totalorder %s16_s10, %s16_s10 }
   0xa   :  { %p242_p3 = scmp.ne.s32.totalorder %s16_s10, %s241_s18  ;;  %p247_p5 = scmp.lt.s32.totalorder %s241_s18, %s241_s18 }
   0xc   :  { %p248_p6 = por %p247_p5, %p246_p4 }
   0xe   :  { %p249_p7 = pnand %p248_p6, %p242_p3 }
  0x10   :  { %252 = shalt.err (!%p249_p7)
}
  0x11   :  { %s304_s19 = smov 256   ;;  %s305_s20 = smov 16  }
  0x12   :  { %21 = dma.hbm_to_vmem [thread:$0]  %s372_s0, 512, %s16_s10, [#allocation3], %s304_s19, %s304_s19, %s305_s20  }
  0x13   :  { %s306_s23 = smov [#allocation5]   ;;  %s253_s27 = scalar_lea.hbm %s373_s1, 256 }
  0x14   :  { %s27_s24 = sshll.u32 %s306_s23, 4  ;;  %p254_p8 = scmp.ne.s32.totalorder %s373_s1, %s253_s27  ;;  %s28_s24 = int_to_ptr.vmem [resolvable:$true] %s27_s24 }
  0x15   :  { %p257_p9 = scmp.lt.u32.totalorder %s253_s27, %s373_s1 }
  0x17   :  { %p259_p10 = pnand %p257_p9, %p254_p8 }
  0x19   :  { %262 = shalt.err (!%p259_p10)
}
  0x1a   :  { %s263_s4 = scalar_lea.vmem %s28_s24, 256  ;;  %p268_p12 = scmp.lt.s32.totalorder %s28_s24, %s28_s24 }
  0x1b   :  { %p264_p11 = scmp.ne.s32.totalorder %s28_s24, %s263_s4  ;;  %p269_p13 = scmp.lt.s32.totalorder %s263_s4, %s263_s4 }
  0x1d   :  { %p270_p0 = por %p269_p13, %p268_p12 }
  0x1f   :  { %p271_p1 = pnand %p270_p0, %p264_p11 }
  0x21   :  { %274 = shalt.err (!%p271_p1)
}
  0x22   :  { %s307_s0 = smov 128   ;;  %s308_s5 = smov 8  }
  0x23   :  { %33 = dma.hbm_to_vmem [thread:$0]  %s373_s1, 256, %s28_s24, [#allocation6], %s307_s0, %s307_s0, %s308_s5  }
  0x24   :  { %297 = dma.done.wait [#allocation3], 512  }
  0x25   :  { %298 = vsyncadd [#allocation3], 4294966784 }
  0x26   :  { %299 = dma.done.wait [#allocation6], 256  }
  0x27   :  { %300 = vsyncadd [#allocation6], 4294967040  ;;  %vm47_vm0 = vcmask 1043456   ;;  %v40_v0 = vld [vmem:[#allocation2] sm:$0xff]  ;;  %v41_v1 = vld [vmem:[#allocation2 + $0x8] sm:$0xff]  ;;  %vm55_vm1 = vcmask 97280  }
  0x28   :  { %v42_v2 = vld [vmem:[#allocation2 + $0x10] sm:$0xf]  ;;  %v44_v3 = vadd.f32 %v41_v1, %v40_v0  ;;  %v43_v4 = vld [vmem:[#allocation2 + $0x18] sm:$0xf]  ;;  %v53_v8 = vld [vmem:[#allocation5] sm:$0xff]  ;;  %vm309_vm2 = vmmov 1  }
  0x29   :  { %v48_v5 = vsel %vm47_vm0, %v42_v2, 0.0  ;;  %v49_v6 = vsel %vm47_vm0, %v43_v4, 0.0  ;;  %203 = vmatprep.mubr.msk.f32.mxu0 %vm55_vm1, %v53_v8  ;;  %vm207_vm3 = vmpackc.low %vm47_vm0, %vm309_vm2  ;;  %v54_v12 = vld [vmem:[#allocation5 + $0x8] sm:$0xf]  ;;  %v310_v13 = vmov 0   ;;  %s311_s1 = smov [#allocation7]  }
  0x2a   :  { %45 = vadd.xlane.f32.xlu0 %v44_v3  ;;  %v50_v7 = vadd.f32 %v49_v6, %v48_v5  ;;  %221 = vset.pattern.permute.xlu1 %v310_v13  ;;  %s177_s8 = sshll.u32 %s311_s1, 4  ;;  %s178_s8 = int_to_ptr.vmem [resolvable:$true] %s177_s8 }
  0x2b   :  { %222 = vset.pattern.permute.xlu0 %v310_v13  ;;  %s275_s9 = scalar_lea.vmem %s178_s8, 512  ;;  %p280_p3 = scmp.lt.s32.totalorder %s178_s8, %s178_s8 }
  0x2c   :  { %p276_p2 = scmp.ne.s32.totalorder %s178_s8, %s275_s9  ;;  %p281_p4 = scmp.lt.s32.totalorder %s275_s9, %s275_s9 }
  0x2e   :  { %51 = vadd.xlane.f32.xlu0 %v50_v7  ;;  %p282_p5 = por %p281_p4, %p280_p3 }
  0x30   :  { %p283_p6 = pnand %p282_p5, %p276_p2 }
  0xb7   :  { %v46_v9 = vpop.xlane.xlu0 %45 }
  0xbb   :  { %v52_v10 = vpop.xlane.xlu0 %51 }
  0xbc   :  { %v206_v11 = vpack.c.bf16 %v52_v10, %v46_v9 }
  0xbe   :  { %208 = vmatprep.subr.msk.bf16.mxu0 %vm207_vm3, %v206_v11 }
  0xbf   :  { %211 = vmatpush3.bf16.msk.msra.mxu0 %vm207_vm3, %v206_v11 }
  0xc2   :  { %204 = vmatmul.mubr.msk.f32.vlgmr.msra.gmra.mrb[0].mxu0 %vm55_vm1, %v54_v12 }
 0x195   :  { %v205_v14 = vpop.f32.mrb[0].mxu0 }
 0x196   :  { %v141_v15 = vmax.f32 %v205_v14, 0.0  ;;  %v131_v16 = vpop.f32.mrb[1].mxu0 }
 0x197   :  { %v140_v17 = vmax.f32 %v131_v16, 0.0 }
 0x198   :  { %v194_v18 = vmul.f32 -1.442695, %v141_v15 }
 0x199   :  { %v193_v19 = vmul.f32 -1.442695, %v140_v17 }
 0x19a   :  { %223 = vpow2.f32 %v194_v18 }
 0x19b   :  { %225 = vpow2.f32 %v193_v19 }
 0x1a4   :  { %v224_v20 = vpop.eup %223 }
 0x1a5   :  { %v226_v21 = vpop.eup %225  ;;  %v149_v23 = vadd.f32 1.0, %v224_v20 }
 0x1a6   :  { %v148_v22 = vadd.f32 1.0, %v226_v21 }
 0x1a8   :  { %227 = vrcp.f32 %v148_v22 }
 0x1a9   :  { %229 = vrcp.f32 %v149_v23 }
 0x1b2   :  { %v228_v24 = vpop.eup %227 }
 0x1b3   :  { %156 = vperm.xlu1 %221, %v228_v24   ;;  %v230_v25 = vpop.eup %229 }
 0x1b7   :  { %161 = vperm.xlu1 %221, %v230_v25  }
 0x232   :  { %v157_v26 = vpop.permute.xlu1 %156 }
 0x233   :  { %v164_v27 = vmul.f32 %v157_v26, %v40_v0  ;;  %v165_v28 = vmul.f32 %v157_v26, %v41_v1 }
 0x235   :  { %168 = vst [vmem:[#allocation7] sm:$0xff] %v164_v27  ;;  %169 = vst [vmem:[#allocation7 + $0x8] sm:$0xff] %v165_v28 }
 0x236   :  { %v162_v29 = vpop.permute.xlu1 %161 }
 0x237   :  { %v166_v30 = vmul.f32 %v162_v29, %v42_v2  ;;  %v167_v31 = vmul.f32 %v162_v29, %v43_v4 }
 0x239   :  { %170 = vst [vmem:[#allocation7 + $0x10] sm:$0xf] %v166_v30  ;;  %171 = vst [vmem:[#allocation7 + $0x18] sm:$0xf] %v167_v31 }
 0x23a   :  { %286 = shalt.err (!%p283_p6)
}
 0x23b   :  { %s287_s12 = scalar_lea.hbm %s374_s2, 512 }
 0x23c   :  { %p288_p7 = scmp.ne.s32.totalorder %s374_s2, %s287_s12  ;;  %p291_p8 = scmp.lt.u32.totalorder %s287_s12, %s374_s2 }
 0x23e   :  { %p293_p9 = pnand %p291_p8, %p288_p7 }
 0x240   :  { %296 = shalt.err (!%p293_p9)
}
 0x241   :  { %183 = dma.vmem_to_hbm [thread:$0]  %s178_s8, 512, %s374_s2, [#allocation4], %s304_s19, %s304_s19, %s305_s20  }
 0x242   :  { %301 = dma.done.wait [#allocation4], 512  }
 0x243   :  { %302 = vsyncadd [#allocation4], 4294966784 }
 0x244   :  { %187 = vsyncpa [#allocation3], 1 }
 0x245   :  { %188 = vsyncpa [#allocation6], 1 }
 0x246   :  { %189 = vsyncpa [#allocation4], 1 }

</bundles_post_ra>
